<compile_context>
chip_gen: v5e
topology: v5e:2x2
jax: 0.10.0
libtpu: 0.0.40
codegen_flags: <defaults>
</compile_context>

<pallas_src>
import jax
import jax.numpy as jnp
from jax.experimental import pallas as pl
from jax.experimental.pallas import tpu as pltpu

# ----- problem sizes (small, consistent with the module) -----
NUM_INPUTS = 4                    # number of tensors passed to forward(*inputs)
FEAT = 8                          # per-input feature dim
INPUT_DIM = NUM_INPUTS * FEAT     # = 32, Linear in_features (cat along last dim)
OUTPUT_DIM = 16                   # Linear out_features
BATCH = 8                         # one sublane group


def _weighted_fusion_kernel(x_ref, wrow_ref, wt_ref, b_ref, o_ref):
    """x_ref:    VMEM (BATCH, INPUT_DIM)      — inputs concatenated along the lane dim.
    wrow_ref: VMEM (1, INPUT_DIM)          — fusion weight per fused column
                                             (weights[i] repeated FEAT times; zip semantics).
    wt_ref:   VMEM (INPUT_DIM, OUTPUT_DIM) — fc.weight.T.
    b_ref:    VMEM (1, OUTPUT_DIM)         — fc.bias.
    o_ref:    VMEM (BATCH, OUTPUT_DIM)."""
    # (w ⊙ x) per column: sublane broadcast on the VPU, identical order to the reference.
    x_scaled = x_ref[...] * wrow_ref[...]
    # One K=INPUT_DIM MXU contraction, f32 accumulation, then a broadcast bias add.
    o_ref[...] = (jnp.dot(x_scaled, wt_ref[...],
                          preferred_element_type=jnp.float32)
                  + b_ref[...]).astype(o_ref.dtype)


def weighted_fusion(fusion_weights, inputs, fc_weight, fc_bias):
    """fusion_weights: (INPUT_DIM,)  -- only the first len(inputs) are used (zip semantics)
    inputs:    tuple of arrays, each (BATCH, FEAT)
    fc_weight: (OUTPUT_DIM, INPUT_DIM)   (PyTorch nn.Linear layout)
    fc_bias:   (OUTPUT_DIM,)
    returns:   (BATCH, OUTPUT_DIM)"""
    num_inputs = len(inputs)
    feat = inputs[0].shape[-1]
    batch = inputs[0].shape[0]
    out_dim = fc_weight.shape[0]
    in_dim = num_inputs * feat

    # One lane-dense fused slab: (BATCH, num_inputs*feat). Single VMEM buffer / single DMA.
    x_fused = jnp.concatenate([x.astype(jnp.float32) for x in inputs], axis=-1)

    # Per-column fusion scale: weights[i] applies to columns [i*feat, (i+1)*feat).
    # Parameter-sized layout plumbing (done once, outside the kernel hot path).
    w_row = jnp.repeat(fusion_weights[:num_inputs].astype(jnp.float32),
                       feat).reshape(1, in_dim)

    wt = fc_weight.T.astype(jnp.float32)                # (INPUT_DIM, OUTPUT_DIM)
    b = fc_bias.reshape(1, out_dim).astype(jnp.float32)

    vmem = pl.BlockSpec(memory_space=pltpu.MemorySpace.VMEM)
    return pl.pallas_call(
        _weighted_fusion_kernel,
        out_shape=jax.ShapeDtypeStruct((batch, out_dim), jnp.float32),
        in_specs=[vmem, vmem, vmem, vmem],
        out_specs=vmem,
    )(x_fused, w_row, wt, b)


def weighted_fusion_ref(fusion_weights, inputs, fc_weight, fc_bias):
    """Pure-JAX reference mirroring the PyTorch forward exactly."""
    weighted = [fusion_weights[i] * x for i, x in enumerate(inputs)]
    fused = jnp.concatenate(weighted, axis=-1)
    return fused @ fc_weight.T + fc_bias


if __name__ == "__main__":
    key = jax.random.PRNGKey(0)
    k_in, k_w, k_b = jax.random.split(key, 3)

    # Parameters (deterministic, matching the module's __init__ shapes).
    fusion_weights = jnp.ones((INPUT_DIM,), jnp.float32)          # nn.Parameter(torch.ones(input_dim))
    bound = 1.0 / jnp.sqrt(jnp.float32(INPUT_DIM))
    fc_weight = jax.random.uniform(k_w, (OUTPUT_DIM, INPUT_DIM),
                                   jnp.float32, -bound, bound)    # nn.Linear weight
    fc_bias = jax.random.uniform(k_b, (OUTPUT_DIM,),
                                 jnp.float32, -bound, bound)      # nn.Linear bias

    # forward(*inputs): NUM_INPUTS tensors of shape (BATCH, FEAT)
    xs_flat = jax.random.normal(k_in, (NUM_INPUTS, BATCH, FEAT), jnp.float32)
    inputs = tuple(xs_flat[i] for i in range(NUM_INPUTS))

    out = weighted_fusion(fusion_weights, inputs, fc_weight, fc_bias)
    out = jax.block_until_ready(out)

    ref = weighted_fusion_ref(fusion_weights, inputs, fc_weight, fc_bias)
    assert out.shape == (BATCH, OUTPUT_DIM)
    assert jnp.allclose(out, ref, atol=1e-5, rtol=1e-5), "mismatch vs reference"

    print("KERNEL_OK")
</pallas_src>

<mosaic_0001>
module attributes {stable_mosaic.version = 11 : i64} {
  func.func @_weighted_fusion_kernel(%arg0: memref<8x32xf32, #tpu.memory_space<vmem>>, %arg1: memref<1x32xf32, #tpu.memory_space<vmem>>, %arg2: memref<32x16xf32, #tpu.memory_space<vmem>>, %arg3: memref<1x16xf32, #tpu.memory_space<vmem>>, %arg4: memref<8x16xf32, #tpu.memory_space<vmem>>) attributes {dimension_semantics = [], scalar_prefetch = 0 : i64, scratch_operands = 0 : i64, tpu.core_type = #tpu.core_type<tc>} {
    %c0 = arith.constant 0 : index
    %c0_0 = arith.constant 0 : index
    %0 = vector.load %arg0[%c0, %c0_0] : memref<8x32xf32, #tpu.memory_space<vmem>>, vector<8x32xf32>
    %c0_1 = arith.constant 0 : index
    %c0_2 = arith.constant 0 : index
    %1 = vector.load %arg1[%c0_1, %c0_2] : memref<1x32xf32, #tpu.memory_space<vmem>>, vector<1x32xf32>
    %2 = vector.broadcast %1 : vector<1x32xf32> to vector<8x32xf32>
    %3 = arith.mulf %0, %2 : vector<8x32xf32>
    %c0_3 = arith.constant 0 : index
    %c0_4 = arith.constant 0 : index
    %4 = vector.load %arg2[%c0_3, %c0_4] : memref<32x16xf32, #tpu.memory_space<vmem>>, vector<32x16xf32>
    %cst = arith.constant dense<0.000000e+00> : vector<8x16xf32>
    %5 = tpu.matmul %3, %4, %cst {dimension_numbers = #tpu.dot_dimension_numbers<[1], [0], [0], [1], [0, 0, 1, 1], [], []>} : vector<8x32xf32>, vector<32x16xf32>, vector<8x16xf32> -> vector<8x16xf32>
    %c0_5 = arith.constant 0 : index
    %c0_6 = arith.constant 0 : index
    %6 = vector.load %arg3[%c0_5, %c0_6] : memref<1x16xf32, #tpu.memory_space<vmem>>, vector<1x16xf32>
    %7 = vector.broadcast %6 : vector<1x16xf32> to vector<8x16xf32>
    %8 = arith.addf %5, %7 : vector<8x16xf32>
    %c0_7 = arith.constant 0 : index
    %c0_8 = arith.constant 0 : index
    %9 = vector.load %arg4[%c0_7, %c0_8] : memref<8x16xf32, #tpu.memory_space<vmem>>, vector<8x16xf32>
    tpu.vector_store %arg4[%c0_7, %c0_8], %8 {strides = array<i32>} : memref<8x16xf32, #tpu.memory_space<vmem>>, vector<8x16xf32>,
    return
  }
}

</mosaic_0001>

<bundles_post_ra>
// kernel: tpu_custom_call.1
= control target key start
LH: loop header
LB: loop body
LE: loop exit
PB: predicated region body
PF: predicated region fallthrough
CT: control target
= control target key end

     0   :  { %s154_s0 = inlined_call_operand.vmem [shape: f32[8,32], index: 0, kind: input, shape index: {}]   ;;  %s155_s1 = inlined_call_operand.vmem [shape: f32[1,32], index: 1, kind: input, shape index: {}]   ;;  %s156_s2 = inlined_call_operand.vmem [shape: f32[32,16], index: 2, kind: input, shape index: {}]   ;;  %s157_s3 = inlined_call_operand.vmem [shape: f32[1,16], index: 3, kind: input, shape index: {}]   ;;  %s158_s4 = inlined_call_operand.hbm [shape: f32[8,16], index: 4, kind: output, shape index: {}]  }
   0x1   :  { %v27_v0 = vld [vmem:[%s156_s2 + $0x18] sm:$0xff]  ;;  %v26_v1 = vld [vmem:[%s156_s2 + $0x10] sm:$0xff]  ;;  %v18_v2 = vld [vmem:[%s154_s0] sm:$0xff] }
   0x2   :  { %48 = vmatpush.msra.mxu0 %v27_v0  ;;  %v25_v3 = vld [vmem:[%s156_s2 + $0x8] sm:$0xff]  ;;  %v76_v4 = vld [vmem:[%s155_s1] ss:$0 sm:$0xff] }
   0x4   :  { %49 = vmatpush.msra.mxu0 %v26_v1 }
   0x5   :  { %9 = vsyncpa [#allocation3], 0  ;;  %v24_v5 = vld [vmem:[%s156_s2] sm:$0xff]  ;;  %v23_v6 = vmul.f32 %v76_v4, %v18_v2  ;;  %vm32_vm0 = vcmask 261120   ;;  %s104_s28 = smov [#allocation2]   ;;  %s65_s1 = sshll.u32 %s158_s4, 4  ;;  %s66_s1 = int_to_ptr.hbm [resolvable:$true] %s65_s1 }
   0x6   :  { %50 = vmatpush.msra.mxu0 %v25_v3  ;;  %v77_v7 = vld [vmem:[%s157_s3] ss:$0 sm:$0xff]  ;;  %s63_s29 = sshll.u32 %s104_s28, 4  ;;  %vm56_vm1 = vcmask 130048   ;;  %s64_s29 = int_to_ptr.vmem [resolvable:$true] %s63_s29 }
   0x8   :  { %51 = vmatpush.msra.mxu0 %v24_v5 }
   0x9   :  { %74 = vmatmul.msk.f32.vlgmr.msra.gmra.mxu0 %vm32_vm0, %v23_v6 }
  0x86   :  { %v53_v8 = vpop.f32.mrf.mxu0 }
  0x87   :  { %v54_v9 = vadd.f32 %v77_v7, %v53_v8 }
  0x89   :  { %57 = vst.msk [vmem:[#allocation2] sm:$0xff] %vm56_vm1, %v54_v9 }
  0x8a   :  { %68 = dma.vmem_to_hbm [thread:$0]  %s64_s29, 128, %s66_s1, [#allocation3]  }
  0x8b   :  { %102 = dma.done.wait [#allocation3], 128  }
  0x8c   :  { %103 = vsyncadd [#allocation3], 4294967168 }
  0x8d   :  { %73 = vsyncpa [#allocation3], 1 }

</bundles_post_ra>
